<compile_context>
chip_gen: v7x
topology: tpu7x:2x2x1
jax: 0.10.0
libtpu: 0.0.40
codegen_flags: <defaults>
</compile_context>

<pallas_src>
import jax
import jax.numpy as jnp
from jax.experimental import pallas as pl
from jax.experimental.pallas import tpu as pltpu

LATENT_DIM = 32
INPUT_DIM = 16
CLUSTER_NUM = 8
N_TRAJ = 8
N_TP = 8


# ----------------------------------------------------------------------------
# Fused kernel: GRU_unit_cluster -> Euler ODE solve -> emitter softmax.
# ----------------------------------------------------------------------------
def _decoder_fused_kernel(t_ref,            # SMEM (n_tp,) f32 time points
                          y0_ref, x0_ref,   # VMEM (B,L), (B,D)
                          w_ur_y_ref,       # VMEM (L, 2L)   [wu_y | wr_y]
                          w_all_x_ref,      # VMEM (D, 3L)   [wu_x | wr_x | wn_x]
                          b_all_ref,        # VMEM (1, 3L)   [bu | br | bn]
                          wn_y_ref,         # VMEM (L, L)
                          w_ode_ref,        # VMEM (L, L)
                          w_emit_ref,       # VMEM (L, C)
                          b_emit_ref,       # VMEM (1, C)
                          states_ref,       # out VMEM ((n_tp-1)*B, L)
                          probs_ref):       # out VMEM ((n_tp-1)*B, C)
    f32 = jnp.float32
    L = wn_y_ref.shape[0]
    B = x0_ref.shape[0]
    n_steps = t_ref.shape[0] - 1

    y0 = y0_ref[...]
    x = x0_ref[...]

    # ---- GRU_unit_cluster(prev_y, x) : fused-gate matmuls -------------------
    # pre = x @ [wu_x|wr_x|wn_x] + [bu|br|bn]   (one MXU push)
    pre = jnp.dot(x, w_all_x_ref[...], preferred_element_type=f32) + b_all_ref[...]
    # yur = y @ [wu_y|wr_y]                     (one MXU push)
    yur = jnp.dot(y0, w_ur_y_ref[...], preferred_element_type=f32)
    u = jax.nn.sigmoid(pre[:, :L] + yur[:, :L])
    r = jax.nn.sigmoid(pre[:, L:2 * L] + yur[:, L:2 * L])
    # new_state_net = Linear (+ Dropout p=0): no nonlinearity (matches reference).
    n = pre[:, 2 * L:] + jnp.dot(y0 * r, wn_y_ref[...], preferred_element_type=f32)
    y = (1.0 - u) * n + u * y0                      # yi_ode

    # ---- ODE solve over time_steps (unrolled, state carried in vregs) -------
    # TODO(synk): z0_diffeq_solver is externally injected (not a parameter of
    # this module). Substituted with forward Euler of dy/dt = tanh(y @ W_ode).
    w_ode = w_ode_ref[...]                          # hoisted out of the loop
    for s in range(n_steps):
        dt = t_ref[s + 1] - t_ref[s]                # scalar (SMEM / scalar unit)
        dy = jnp.tanh(jnp.dot(y, w_ode, preferred_element_type=f32))
        y = y + dt * dy
        states_ref[pl.ds(s * B, B), :] = y          # solution at time_steps[s+1]

    # ---- emitter: softmax(Linear_{L->C}) over ALL states in one matmul ------
    h = states_ref[...]                             # ((n_tp-1)*B, L)
    logits = jnp.dot(h, w_emit_ref[...], preferred_element_type=f32) + b_emit_ref[...]
    m = jnp.max(logits, axis=-1, keepdims=True)
    e = jnp.exp(logits - m)
    probs_ref[...] = e * pl.reciprocal(jnp.sum(e, axis=-1, keepdims=True), approx=False)


# ----------------------------------------------------------------------------
# Wrapper (forward, run_odernn path).
# ----------------------------------------------------------------------------
def decoder_forward(data, time_steps, fused_params, prev_y_state=None):
    n_traj, n_tp, n_dims = data.shape
    L = fused_params["wn_y"].shape[0]
    C = fused_params["w_emit"].shape[1]

    if prev_y_state is None:                         # torch: zeros((1, B, L))
        prev_y_state = jnp.zeros((n_traj, L), jnp.float32)
    x0 = data[:, 0, :].astype(jnp.float32)           # torch: data[:, 0, :].unsqueeze(0)
    ts = time_steps.astype(jnp.float32)

    vmem = pl.BlockSpec(memory_space=pltpu.MemorySpace.VMEM)
    smem = pl.BlockSpec(memory_space=pltpu.MemorySpace.SMEM)

    states_flat, probs_flat = pl.pallas_call(
        _decoder_fused_kernel,
        out_shape=(
            jax.ShapeDtypeStruct(((n_tp - 1) * n_traj, L), jnp.float32),
            jax.ShapeDtypeStruct(((n_tp - 1) * n_traj, C), jnp.float32),
        ),
        in_specs=[smem] + [vmem] * 9,
        out_specs=(vmem, vmem),
    )(ts, prev_y_state, x0,
      fused_params["w_ur_y"], fused_params["w_all_x"], fused_params["b_all"],
      fused_params["wn_y"], fused_params["w_ode"],
      fused_params["w_emit"], fused_params["b_emit"])

    # Wrapper-side layout plumbing (free): back to the PyTorch output shapes.
    latent_y_states = states_flat.reshape(n_tp - 1, n_traj, L)[None]   # (1, n_tp-1, B, L)
    latent_ys = probs_flat.reshape(n_tp - 1, n_traj, C)[None]          # (1, n_tp-1, B, C)
    return latent_ys, latent_y_states


# ----------------------------------------------------------------------------
# Parameters (module layout) + one-time host-side gate-weight fusion.
# ----------------------------------------------------------------------------
def init_params(key, latent_dim, input_dim, cluster_num):
    ks = jax.random.split(key, 10)
    s = 0.1
    f = jnp.float32
    return {
        # GRU_unit_cluster (Linear weights stored as (in, out); bias (1, out))
        "wu_y": s * jax.random.normal(ks[0], (latent_dim, latent_dim), f),
        "wu_x": s * jax.random.normal(ks[1], (input_dim, latent_dim), f),
        "bu":   s * jax.random.normal(ks[2], (1, latent_dim), f),
        "wr_y": s * jax.random.normal(ks[3], (latent_dim, latent_dim), f),
        "wr_x": s * jax.random.normal(ks[4], (input_dim, latent_dim), f),
        "br":   s * jax.random.normal(ks[5], (1, latent_dim), f),
        "wn_y": s * jax.random.normal(ks[6], (latent_dim, latent_dim), f),
        "wn_x": s * jax.random.normal(ks[7], (input_dim, latent_dim), f),
        "bn":   s * jax.random.normal(ks[8], (1, latent_dim), f),
        # infer_emitter_z
        "w_emit": s * jax.random.normal(ks[9], (latent_dim, cluster_num), f),
        "b_emit": jnp.zeros((1, cluster_num), f),
        # synthetic ODE-func weight for the substituted z0_diffeq_solver
        "w_ode": s * jax.random.normal(jax.random.PRNGKey(42), (latent_dim, latent_dim), f),
        # NOTE: infer_transfer_z and decayed_layer exist in __init__ but are
        # unused by forward(), so they are not instantiated here.
    }


def fuse_params(p):
    """One-time host-side weight concatenation (cuts GRU MXU pushes 6 -> 3)."""
    return {
        "w_ur_y":  jnp.concatenate([p["wu_y"], p["wr_y"]], axis=1),          # (L, 2L)
        "w_all_x": jnp.concatenate([p["wu_x"], p["wr_x"], p["wn_x"]], axis=1),  # (D, 3L)
        "b_all":   jnp.concatenate([p["bu"], p["br"], p["bn"]], axis=1),     # (1, 3L)
        "wn_y":    p["wn_y"],
        "w_ode":   p["w_ode"],
        "w_emit":  p["w_emit"],
        "b_emit":  p["b_emit"],
    }


if __name__ == "__main__":
    key = jax.random.PRNGKey(0)
    kp, kd = jax.random.split(key)
    params = init_params(kp, LATENT_DIM, INPUT_DIM, CLUSTER_NUM)
    fused = fuse_params(params)          # done once, outside the jitted forward

    data = jax.random.normal(kd, (N_TRAJ, N_TP, INPUT_DIM), jnp.float32)
    time_steps = jnp.linspace(0.0, 1.0, N_TP).astype(jnp.float32)

    latent_ys, latent_y_states = jax.jit(decoder_forward)(data, time_steps, fused)
    jax.block_until_ready((latent_ys, latent_y_states))

    assert latent_ys.shape == (1, N_TP - 1, N_TRAJ, CLUSTER_NUM)
    assert latent_y_states.shape == (1, N_TP - 1, N_TRAJ, LATENT_DIM)
    assert bool(jnp.all(jnp.isfinite(latent_ys)))
    assert bool(jnp.all(jnp.isfinite(latent_y_states)))
    assert bool(jnp.allclose(jnp.sum(latent_ys, axis=-1), 1.0, atol=1e-5))
    print("KERNEL_OK")
</pallas_src>

<mosaic_0001>
module attributes {stable_mosaic.version = 11 : i64} {
  func.func @_decoder_fused_kernel(%arg0: memref<8xf32, #tpu.memory_space<smem>>, %arg1: memref<8x32xf32, #tpu.memory_space<vmem>>, %arg2: memref<8x16xf32, #tpu.memory_space<vmem>>, %arg3: memref<32x64xf32, #tpu.memory_space<vmem>>, %arg4: memref<16x96xf32, #tpu.memory_space<vmem>>, %arg5: memref<1x96xf32, #tpu.memory_space<vmem>>, %arg6: memref<32x32xf32, #tpu.memory_space<vmem>>, %arg7: memref<32x32xf32, #tpu.memory_space<vmem>>, %arg8: memref<32x8xf32, #tpu.memory_space<vmem>>, %arg9: memref<1x8xf32, #tpu.memory_space<vmem>>, %arg10: memref<56x32xf32, #tpu.memory_space<vmem>>, %arg11: memref<56x8xf32, #tpu.memory_space<vmem>>) attributes {dimension_semantics = [], scalar_prefetch = 0 : i64, scratch_operands = 0 : i64, tpu.core_type = #tpu.core_type<tc>} {
    %c0 = arith.constant 0 : index
    %c0_0 = arith.constant 0 : index
    %0 = vector.load %arg1[%c0, %c0_0] : memref<8x32xf32, #tpu.memory_space<vmem>>, vector<8x32xf32>
    %c0_1 = arith.constant 0 : index
    %c0_2 = arith.constant 0 : index
    %1 = vector.load %arg2[%c0_1, %c0_2] : memref<8x16xf32, #tpu.memory_space<vmem>>, vector<8x16xf32>
    %c0_3 = arith.constant 0 : index
    %c0_4 = arith.constant 0 : index
    %2 = vector.load %arg4[%c0_3, %c0_4] : memref<16x96xf32, #tpu.memory_space<vmem>>, vector<16x96xf32>
    %cst = arith.constant dense<0.000000e+00> : vector<8x96xf32>
    %3 = tpu.matmul %1, %2, %cst {dimension_numbers = #tpu.dot_dimension_numbers<[1], [0], [0], [1], [0, 0, 1, 1], [], []>} : vector<8x16xf32>, vector<16x96xf32>, vector<8x96xf32> -> vector<8x96xf32>
    %c0_5 = arith.constant 0 : index
    %c0_6 = arith.constant 0 : index
    %4 = vector.load %arg5[%c0_5, %c0_6] : memref<1x96xf32, #tpu.memory_space<vmem>>, vector<1x96xf32>
    %5 = vector.broadcast %4 : vector<1x96xf32> to vector<8x96xf32>
    %6 = arith.addf %3, %5 : vector<8x96xf32>
    %c0_7 = arith.constant 0 : index
    %c0_8 = arith.constant 0 : index
    %7 = vector.load %arg3[%c0_7, %c0_8] : memref<32x64xf32, #tpu.memory_space<vmem>>, vector<32x64xf32>
    %cst_9 = arith.constant dense<0.000000e+00> : vector<8x64xf32>
    %8 = tpu.matmul %0, %7, %cst_9 {dimension_numbers = #tpu.dot_dimension_numbers<[1], [0], [0], [1], [0, 0, 1, 1], [], []>} : vector<8x32xf32>, vector<32x64xf32>, vector<8x64xf32> -> vector<8x64xf32>
    %9 = vector.extract_strided_slice %6 {offsets = [0, 0], sizes = [8, 32], strides = [1, 1]} : vector<8x96xf32> to vector<8x32xf32>
    %10 = vector.extract_strided_slice %8 {offsets = [0, 0], sizes = [8, 32], strides = [1, 1]} : vector<8x64xf32> to vector<8x32xf32>
    %11 = arith.addf %9, %10 : vector<8x32xf32>
    %12 = arith.negf %11 : vector<8x32xf32>
    %13 = math.exp %12 : vector<8x32xf32>
    %cst_10 = arith.constant 1.000000e+00 : f32
    %14 = vector.broadcast %cst_10 : f32 to vector<8x32xf32>
    %15 = arith.addf %14, %13 : vector<8x32xf32>
    %16 = arith.divf %14, %15 : vector<8x32xf32>
    %17 = vector.extract_strided_slice %6 {offsets = [0, 32], sizes = [8, 32], strides = [1, 1]} : vector<8x96xf32> to vector<8x32xf32>
    %18 = vector.extract_strided_slice %8 {offsets = [0, 32], sizes = [8, 32], strides = [1, 1]} : vector<8x64xf32> to vector<8x32xf32>
    %19 = arith.addf %17, %18 : vector<8x32xf32>
    %20 = arith.negf %19 : vector<8x32xf32>
    %21 = math.exp %20 : vector<8x32xf32>
    %cst_11 = arith.constant 1.000000e+00 : f32
    %22 = vector.broadcast %cst_11 : f32 to vector<8x32xf32>
    %23 = arith.addf %22, %21 : vector<8x32xf32>
    %24 = arith.divf %22, %23 : vector<8x32xf32>
    %25 = vector.extract_strided_slice %6 {offsets = [0, 64], sizes = [8, 32], strides = [1, 1]} : vector<8x96xf32> to vector<8x32xf32>
    %26 = arith.mulf %0, %24 : vector<8x32xf32>
    %c0_12 = arith.constant 0 : index
    %c0_13 = arith.constant 0 : index
    %27 = vector.load %arg6[%c0_12, %c0_13] : memref<32x32xf32, #tpu.memory_space<vmem>>, vector<32x32xf32>
    %cst_14 = arith.constant dense<0.000000e+00> : vector<8x32xf32>
    %28 = tpu.matmul %26, %27, %cst_14 {dimension_numbers = #tpu.dot_dimension_numbers<[1], [0], [0], [1], [0, 0, 1, 1], [], []>} : vector<8x32xf32>, vector<32x32xf32>, vector<8x32xf32> -> vector<8x32xf32>
    %29 = arith.addf %25, %28 : vector<8x32xf32>
    %cst_15 = arith.constant 1.000000e+00 : f32
    %30 = vector.broadcast %cst_15 : f32 to vector<8x32xf32>
    %31 = arith.subf %30, %16 : vector<8x32xf32>
    %32 = arith.mulf %31, %29 : vector<8x32xf32>
    %33 = arith.mulf %16, %0 : vector<8x32xf32>
    %34 = arith.addf %32, %33 : vector<8x32xf32>
    %c0_16 = arith.constant 0 : index
    %c0_17 = arith.constant 0 : index
    %35 = vector.load %arg7[%c0_16, %c0_17] : memref<32x32xf32, #tpu.memory_space<vmem>>, vector<32x32xf32>
    %c1 = arith.constant 1 : index
    %36 = memref.load %arg0[%c1] : memref<8xf32, #tpu.memory_space<smem>>
    %c0_18 = arith.constant 0 : index
    %37 = memref.load %arg0[%c0_18] : memref<8xf32, #tpu.memory_space<smem>>
    %38 = arith.subf %36, %37 : f32
    %cst_19 = arith.constant dense<0.000000e+00> : vector<8x32xf32>
    %39 = tpu.matmul %34, %35, %cst_19 {dimension_numbers = #tpu.dot_dimension_numbers<[1], [0], [0], [1], [0, 0, 1, 1], [], []>} : vector<8x32xf32>, vector<32x32xf32>, vector<8x32xf32> -> vector<8x32xf32>
    %40 = math.tanh %39 : vector<8x32xf32>
    %41 = vector.broadcast %38 : f32 to vector<8x32xf32>
    %42 = arith.mulf %41, %40 : vector<8x32xf32>
    %43 = arith.addf %34, %42 : vector<8x32xf32>
    %c0_20 = arith.constant 0 : index
    %c0_21 = arith.constant 0 : index
    %44 = vector.load %arg10[%c0_20, %c0_21] : memref<56x32xf32, #tpu.memory_space<vmem>>, vector<8x32xf32>
    tpu.vector_store %arg10[%c0_20, %c0_21], %43 {strides = array<i32>} : memref<56x32xf32, #tpu.memory_space<vmem>>, vector<8x32xf32>,
    %c2 = arith.constant 2 : index
    %45 = memref.load %arg0[%c2] : memref<8xf32, #tpu.memory_space<smem>>
    %c1_22 = arith.constant 1 : index
    %46 = memref.load %arg0[%c1_22] : memref<8xf32, #tpu.memory_space<smem>>
    %47 = arith.subf %45, %46 : f32
    %cst_23 = arith.constant dense<0.000000e+00> : vector<8x32xf32>
    %48 = tpu.matmul %43, %35, %cst_23 {dimension_numbers = #tpu.dot_dimension_numbers<[1], [0], [0], [1], [0, 0, 1, 1], [], []>} : vector<8x32xf32>, vector<32x32xf32>, vector<8x32xf32> -> vector<8x32xf32>
    %49 = math.tanh %48 : vector<8x32xf32>
    %50 = vector.broadcast %47 : f32 to vector<8x32xf32>
    %51 = arith.mulf %50, %49 : vector<8x32xf32>
    %52 = arith.addf %43, %51 : vector<8x32xf32>
    %c8 = arith.constant 8 : index
    %c0_24 = arith.constant 0 : index
    %53 = vector.load %arg10[%c8, %c0_24] : memref<56x32xf32, #tpu.memory_space<vmem>>, vector<8x32xf32>
    tpu.vector_store %arg10[%c8, %c0_24], %52 {strides = array<i32>} : memref<56x32xf32, #tpu.memory_space<vmem>>, vector<8x32xf32>,
    %c3 = arith.constant 3 : index
    %54 = memref.load %arg0[%c3] : memref<8xf32, #tpu.memory_space<smem>>
    %c2_25 = arith.constant 2 : index
    %55 = memref.load %arg0[%c2_25] : memref<8xf32, #tpu.memory_space<smem>>
    %56 = arith.subf %54, %55 : f32
    %cst_26 = arith.constant dense<0.000000e+00> : vector<8x32xf32>
    %57 = tpu.matmul %52, %35, %cst_26 {dimension_numbers = #tpu.dot_dimension_numbers<[1], [0], [0], [1], [0, 0, 1, 1], [], []>} : vector<8x32xf32>, vector<32x32xf32>, vector<8x32xf32> -> vector<8x32xf32>
    %58 = math.tanh %57 : vector<8x32xf32>
    %59 = vector.broadcast %56 : f32 to vector<8x32xf32>
    %60 = arith.mulf %59, %58 : vector<8x32xf32>
    %61 = arith.addf %52, %60 : vector<8x32xf32>
    %c16 = arith.constant 16 : index
    %c0_27 = arith.constant 0 : index
    %62 = vector.load %arg10[%c16, %c0_27] : memref<56x32xf32, #tpu.memory_space<vmem>>, vector<8x32xf32>
    tpu.vector_store %arg10[%c16, %c0_27], %61 {strides = array<i32>} : memref<56x32xf32, #tpu.memory_space<vmem>>, vector<8x32xf32>,
    %c4 = arith.constant 4 : index
    %63 = memref.load %arg0[%c4] : memref<8xf32, #tpu.memory_space<smem>>
    %c3_28 = arith.constant 3 : index
    %64 = memref.load %arg0[%c3_28] : memref<8xf32, #tpu.memory_space<smem>>
    %65 = arith.subf %63, %64 : f32
    %cst_29 = arith.constant dense<0.000000e+00> : vector<8x32xf32>
    %66 = tpu.matmul %61, %35, %cst_29 {dimension_numbers = #tpu.dot_dimension_numbers<[1], [0], [0], [1], [0, 0, 1, 1], [], []>} : vector<8x32xf32>, vector<32x32xf32>, vector<8x32xf32> -> vector<8x32xf32>
    %67 = math.tanh %66 : vector<8x32xf32>
    %68 = vector.broadcast %65 : f32 to vector<8x32xf32>
    %69 = arith.mulf %68, %67 : vector<8x32xf32>
    %70 = arith.addf %61, %69 : vector<8x32xf32>
    %c24 = arith.constant 24 : index
    %c0_30 = arith.constant 0 : index
    %71 = vector.load %arg10[%c24, %c0_30] : memref<56x32xf32, #tpu.memory_space<vmem>>, vector<8x32xf32>
    tpu.vector_store %arg10[%c24, %c0_30], %70 {strides = array<i32>} : memref<56x32xf32, #tpu.memory_space<vmem>>, vector<8x32xf32>,
    %c5 = arith.constant 5 : index
    %72 = memref.load %arg0[%c5] : memref<8xf32, #tpu.memory_space<smem>>
    %c4_31 = arith.constant 4 : index
    %73 = memref.load %arg0[%c4_31] : memref<8xf32, #tpu.memory_space<smem>>
    %74 = arith.subf %72, %73 : f32
    %cst_32 = arith.constant dense<0.000000e+00> : vector<8x32xf32>
    %75 = tpu.matmul %70, %35, %cst_32 {dimension_numbers = #tpu.dot_dimension_numbers<[1], [0], [0], [1], [0, 0, 1, 1], [], []>} : vector<8x32xf32>, vector<32x32xf32>, vector<8x32xf32> -> vector<8x32xf32>
    %76 = math.tanh %75 : vector<8x32xf32>
    %77 = vector.broadcast %74 : f32 to vector<8x32xf32>
    %78 = arith.mulf %77, %76 : vector<8x32xf32>
    %79 = arith.addf %70, %78 : vector<8x32xf32>
    %c32 = arith.constant 32 : index
    %c0_33 = arith.constant 0 : index
    %80 = vector.load %arg10[%c32, %c0_33] : memref<56x32xf32, #tpu.memory_space<vmem>>, vector<8x32xf32>
    tpu.vector_store %arg10[%c32, %c0_33], %79 {strides = array<i32>} : memref<56x32xf32, #tpu.memory_space<vmem>>, vector<8x32xf32>,
    %c6 = arith.constant 6 : index
    %81 = memref.load %arg0[%c6] : memref<8xf32, #tpu.memory_space<smem>>
    %c5_34 = arith.constant 5 : index
    %82 = memref.load %arg0[%c5_34] : memref<8xf32, #tpu.memory_space<smem>>
    %83 = arith.subf %81, %82 : f32
    %cst_35 = arith.constant dense<0.000000e+00> : vector<8x32xf32>
    %84 = tpu.matmul %79, %35, %cst_35 {dimension_numbers = #tpu.dot_dimension_numbers<[1], [0], [0], [1], [0, 0, 1, 1], [], []>} : vector<8x32xf32>, vector<32x32xf32>, vector<8x32xf32> -> vector<8x32xf32>
    %85 = math.tanh %84 : vector<8x32xf32>
    %86 = vector.broadcast %83 : f32 to vector<8x32xf32>
    %87 = arith.mulf %86, %85 : vector<8x32xf32>
    %88 = arith.addf %79, %87 : vector<8x32xf32>
    %c40 = arith.constant 40 : index
    %c0_36 = arith.constant 0 : index
    %89 = vector.load %arg10[%c40, %c0_36] : memref<56x32xf32, #tpu.memory_space<vmem>>, vector<8x32xf32>
    tpu.vector_store %arg10[%c40, %c0_36], %88 {strides = array<i32>} : memref<56x32xf32, #tpu.memory_space<vmem>>, vector<8x32xf32>,
    %c7 = arith.constant 7 : index
    %90 = memref.load %arg0[%c7] : memref<8xf32, #tpu.memory_space<smem>>
    %c6_37 = arith.constant 6 : index
    %91 = memref.load %arg0[%c6_37] : memref<8xf32, #tpu.memory_space<smem>>
    %92 = arith.subf %90, %91 : f32
    %cst_38 = arith.constant dense<0.000000e+00> : vector<8x32xf32>
    %93 = tpu.matmul %88, %35, %cst_38 {dimension_numbers = #tpu.dot_dimension_numbers<[1], [0], [0], [1], [0, 0, 1, 1], [], []>} : vector<8x32xf32>, vector<32x32xf32>, vector<8x32xf32> -> vector<8x32xf32>
    %94 = math.tanh %93 : vector<8x32xf32>
    %95 = vector.broadcast %92 : f32 to vector<8x32xf32>
    %96 = arith.mulf %95, %94 : vector<8x32xf32>
    %97 = arith.addf %88, %96 : vector<8x32xf32>
    %c48 = arith.constant 48 : index
    %c0_39 = arith.constant 0 : index
    %98 = vector.load %arg10[%c48, %c0_39] : memref<56x32xf32, #tpu.memory_space<vmem>>, vector<8x32xf32>
    tpu.vector_store %arg10[%c48, %c0_39], %97 {strides = array<i32>} : memref<56x32xf32, #tpu.memory_space<vmem>>, vector<8x32xf32>,
    %c0_40 = arith.constant 0 : index
    %c0_41 = arith.constant 0 : index
    %99 = vector.load %arg10[%c0_40, %c0_41] : memref<56x32xf32, #tpu.memory_space<vmem>>, vector<56x32xf32>
    %c0_42 = arith.constant 0 : index
    %c0_43 = arith.constant 0 : index
    %100 = vector.load %arg8[%c0_42, %c0_43] : memref<32x8xf32, #tpu.memory_space<vmem>>, vector<32x8xf32>
    %cst_44 = arith.constant dense<0.000000e+00> : vector<56x8xf32>
    %101 = tpu.matmul %99, %100, %cst_44 {dimension_numbers = #tpu.dot_dimension_numbers<[1], [0], [0], [1], [0, 0, 1, 1], [], []>} : vector<56x32xf32>, vector<32x8xf32>, vector<56x8xf32> -> vector<56x8xf32>
    %c0_45 = arith.constant 0 : index
    %c0_46 = arith.constant 0 : index
    %102 = vector.load %arg9[%c0_45, %c0_46] : memref<1x8xf32, #tpu.memory_space<vmem>>, vector<1x8xf32>
    %103 = vector.broadcast %102 : vector<1x8xf32> to vector<56x8xf32>
    %104 = arith.addf %101, %103 : vector<56x8xf32>
    %cst_47 = arith.constant dense<0xFF800000> : vector<56xf32>
    %105 = vector.multi_reduction <maximumf>, %104, %cst_47 [1] : vector<56x8xf32> to vector<56xf32>
    %106 = vector.shape_cast %105 : vector<56xf32> to vector<56x1xf32>
    %107 = vector.broadcast %106 : vector<56x1xf32> to vector<56x8xf32>
    %108 = arith.subf %104, %107 : vector<56x8xf32>
    %109 = math.exp %108 : vector<56x8xf32>
    %cst_48 = arith.constant dense<0.000000e+00> : vector<56xf32>
    %110 = vector.multi_reduction <add>, %109, %cst_48 [1] : vector<56x8xf32> to vector<56xf32>
    %111 = vector.shape_cast %110 : vector<56xf32> to vector<56x1xf32>
    %112 = tpu.reciprocal %111 : vector<56x1xf32> -> vector<56x1xf32>
    %113 = vector.broadcast %112 : vector<56x1xf32> to vector<56x8xf32>
    %114 = arith.mulf %109, %113 : vector<56x8xf32>
    %c0_49 = arith.constant 0 : index
    %c0_50 = arith.constant 0 : index
    %115 = vector.load %arg11[%c0_49, %c0_50] : memref<56x8xf32, #tpu.memory_space<vmem>>, vector<56x8xf32>
    tpu.vector_store %arg11[%c0_49, %c0_50], %114 {strides = array<i32>} : memref<56x8xf32, #tpu.memory_space<vmem>>, vector<56x8xf32>,
    return
  }
}

</mosaic_0001>

<bundles_post_ra>
// kernel: decoder_forward.1
= control target key start
LH: loop header
LB: loop body
LE: loop exit
PB: predicated region body
PF: predicated region fallthrough
CT: control target
= control target key end

     0   :  { %17 = vsyncpa [#allocation5], 0  ;;  %s2011_s0 = inlined_call_operand.hbm [shape: f32[8], index: 0, kind: input, shape index: {}]   ;;  %s2012_s1 = inlined_call_operand.vmem [shape: f32[8,32], index: 1, kind: input, shape index: {}]   ;;  %s2013_s2 = inlined_call_operand.vmem [shape: f32[8,16], index: 2, kind: input, shape index: {}]   ;;  %s2014_s3 = inlined_call_operand.vmem [shape: f32[32,64], index: 3, kind: input, shape index: {}]   ;;  %s2015_s4 = inlined_call_operand.vmem [shape: f32[16,96], index: 4, kind: input, shape index: {}]   ;;  %s2016_s5 = inlined_call_operand.hbm [shape: f32[1,96], index: 5, kind: input, shape index: {}]   ;;  %s2017_s6 = inlined_call_operand.vmem [shape: f32[32,32], index: 6, kind: input, shape index: {}]   ;;  %s2018_s7 = inlined_call_operand.hbm [shape: f32[32,32], index: 7, kind: input, shape index: {}]   ;;  %s2019_s8 = inlined_call_operand.vmem [shape: f32[32,8], index: 8, kind: input, shape index: {}]   ;;  %s2020_s9 = inlined_call_operand.hbm [shape: f32[1,8], index: 9, kind: input, shape index: {}]   ;;  %s2021_s10 = inlined_call_operand.hbm [shape: f32[56,32], index: 10, kind: output, shape index: {0}]   ;;  %s2022_s11 = inlined_call_operand.hbm [shape: f32[56,8], index: 11, kind: output, shape index: {1}]  }
   0x1   :  { %18 = vsyncpa [#allocation3], 0 }
   0x2   :  { %19 = vsyncpa [#allocation8], 0 }
   0x3   :  { %20 = vsyncpa [#allocation4], 0 }
   0x4   :  { %21 = vsyncpa [#allocation12], 0  ;;  %s1665_s17 = smov [#allocation7]   ;;  %s1535_s21 = scalar_lea.hbm %s2018_s7, 512 }
   0x5   :  { %s55_s18 = sshll.u32 %s1665_s17, 4  ;;  %p1536_p0 = scmp.ne.s32.totalorder %s2018_s7, %s1535_s21  ;;  %s56_s18 = int_to_ptr.vmem [resolvable:$true] %s55_s18 }
   0x6   :  { %p1539_p1 = scmp.lt.u32.totalorder %s1535_s21, %s2018_s7 }
   0x8   :  { %p1541_p2 = pnand %p1539_p1, %p1536_p0 }
   0xa   :  { %1544 = shalt.err (!%p1541_p2)
}
   0xb   :  { %s1545_s26 = scalar_lea.vmem %s56_s18, 512  ;;  %p1550_p4 = scmp.lt.s32.totalorder %s56_s18, %s56_s18 }
   0xc   :  { %p1546_p3 = scmp.ne.s32.totalorder %s56_s18, %s1545_s26  ;;  %p1551_p5 = scmp.lt.s32.totalorder %s1545_s26, %s1545_s26 }
   0xe   :  { %p1552_p6 = por %p1551_p5, %p1550_p4 }
  0x10   :  { %p1553_p7 = pnand %p1552_p6, %p1546_p3 }
  0x12   :  { %1556 = shalt.err (!%p1553_p7)
}
  0x13   :  { %s1666_s27 = smov 128   ;;  %s1667_s28 = smov 8  }
  0x14   :  { %61 = dma.hbm_to_vmem [thread:$0]  %s2018_s7, 512, %s56_s18, [#allocation8], %s1666_s27, %s1666_s27, %s1667_s28  }
  0x15   :  { %s1557_s14 = scalar_lea.hbm %s2011_s0, 16 }
  0x16   :  { %p1558_p8 = scmp.ne.s32.totalorder %s2011_s0, %s1557_s14  ;;  %p1561_p9 = scmp.lt.u32.totalorder %s1557_s14, %s2011_s0 }
  0x18   :  { %p1563_p10 = pnand %p1561_p9, %p1558_p8 }
  0x1a   :  { %1566 = shalt.err (!%p1563_p10)
}
  0x1b   :  { %s1668_s20 = smov [#allocation2]   ;;  %s1669_s7 = smov [#allocation6]  }
  0x1c   :  { %29 = dma.hbm_to_smem %s2011_s0, 16, %s1668_s20, [#allocation5]  }
  0x1d   :  { %s44_s18 = sshll.u32 %s1669_s7, 4  ;;  %s1670_s23 = smov [#allocation9]   ;;  %s45_s18 = int_to_ptr.vmem [resolvable:$true] %s44_s18 }
  0x1e   :  { %s70_s24 = sshll.u32 %s1670_s23, 4  ;;  %s1567_s29 = scalar_lea.hbm %s2016_s5, 16  ;;  %s71_s24 = int_to_ptr.vmem [resolvable:$true] %s70_s24 }
  0x1f   :  { %p1568_p11 = scmp.ne.s32.totalorder %s2016_s5, %s1567_s29  ;;  %p1571_p12 = scmp.lt.u32.totalorder %s1567_s29, %s2016_s5 }
  0x21   :  { %p1573_p13 = pnand %p1571_p12, %p1568_p11 }
  0x23   :  { %1576 = shalt.err (!%p1573_p13)
}
  0x24   :  { %s1577_s0 = scalar_lea.vmem %s45_s18, 16  ;;  %s1581_s15 = scalar_lea.vmem %s45_s18, 32 }
  0x25   :  { %p1578_p0 = scmp.ne.s32.totalorder %s45_s18, %s1577_s0  ;;  %p1582_p1 = scmp.lt.s32.totalorder %s45_s18, %s45_s18 }
  0x26   :  { %p1583_p2 = scmp.lt.s32.totalorder %s1581_s15, %s1577_s0 }
  0x28   :  { %p1584_p3 = por %p1583_p2, %p1582_p1 }
  0x2a   :  { %p1585_p4 = pnand %p1584_p3, %p1578_p0 }
  0x2c   :  { %1588 = shalt.err (!%p1585_p4)
}
  0x2d   :  { %47 = dma.hbm_to_vmem [thread:$0]  %s2016_s5, 16, %s45_s18, [#allocation3]  }
  0x2e   :  { %s1589_s21 = scalar_lea.hbm %s2020_s9, 16 }
  0x2f   :  { %p1590_p5 = scmp.ne.s32.totalorder %s2020_s9, %s1589_s21  ;;  %p1593_p6 = scmp.lt.u32.totalorder %s1589_s21, %s2020_s9 }
  0x31   :  { %p1595_p7 = pnand %p1593_p6, %p1590_p5 }
  0x33   :  { %1598 = shalt.err (!%p1595_p7)
}
  0x34   :  { %s1599_s26 = scalar_lea.vmem %s71_s24, 16  ;;  %s1603_s29 = scalar_lea.vmem %s71_s24, 32 }
  0x35   :  { %p1600_p8 = scmp.ne.s32.totalorder %s71_s24, %s1599_s26  ;;  %p1604_p9 = scmp.lt.s32.totalorder %s71_s24, %s71_s24 }
  0x36   :  { %p1605_p10 = scmp.lt.s32.totalorder %s1603_s29, %s1599_s26 }
  0x38   :  { %p1606_p11 = por %p1605_p10, %p1604_p9 }
  0x3a   :  { %p1607_p12 = pnand %p1606_p11, %p1600_p8 }
  0x3c   :  { %1610 = shalt.err (!%p1607_p12)
}
  0x3d   :  { %73 = dma.hbm_to_vmem [thread:$0]  %s2020_s9, 16, %s71_s24, [#allocation8]  }
  0x3e   :  { %1655 = dma.done.wait [#allocation5], 16  }
  0x3f   :  { %1656 = vsyncadd [#allocation5], 4294967280 }
  0x40   :  { %1657 = dma.done.wait [#allocation3], 16  }
  0x41   :  { %1658 = vsyncadd [#allocation3], 4294967280 }
  0x42   :  { %1659 = dma.done.wait [#allocation8], 528  }
  0x43   :  { %1660 = vsyncadd [#allocation8], 4294966768 }
  0x44   :  { %86 = sfence }
  0x45   :  { %v172_v0 = vld [vmem:[%s2014_s3] sm:$0xff]  ;;  %v173_v1 = vld [vmem:[%s2014_s3 + $0x8] sm:$0xff]  ;;  %v1671_v3 = vmov 0.0|0.0   ;;  %v174_v6 = vld [vmem:[%s2014_s3 + $0x10] sm:$0xff]  ;;  %vm1672_vm0 = vmmov 0   ;;  %v1673_v8 = vmov 0.0  }
  0x46   :  { %v89_v2 = vld [vmem:[%s2015_s4] sm:$0xff]  ;;  %1412 = vmatprep.subr.bf16.mxu1 %v1671_v3  ;;  %1409 = vmatprep.subr.bf16.mxu0 %v1671_v3  ;;  %v1413_v4 = vpack.c.bf16 %v173_v1, %v172_v0  ;;  %v90_v5 = vld [vmem:[%s2015_s4 + $0x8] sm:$0xff]  ;;  %v175_v9 = vld [vmem:[%s2014_s3 + $0x18] sm:$0xff]  ;;  %vm98_vm1 = vcmask 130048   ;;  %vm176_vm2 = vcmask 261120   ;;  %s1675_s18 = smov 64  }
  0x47   :  { %v1410_v7 = vpack.c.bf16 %v90_v5, %v89_v2  ;;  %1278 = vmatprep.mubr.msk.f32.mxu0 %vm1672_vm0, %v1673_v8  ;;  %1289 = vmatprep.mubr.msk.f32.mxu1 %vm1672_vm0, %v1673_v8  ;;  %v1416_v10 = vpack.c.bf16 %v175_v9, %v174_v6  ;;  %v88_v11 = vld [vmem:[%s2013_s2] sm:$0xff]  ;;  %v263_v14 = vld [vmem:[%s2017_s6 + $0x8] sm:$0xff]  ;;  %v264_v15 = vld [vmem:[%s2017_s6 + $0x10] sm:$0xff]  ;;  %s1187_s30 = sld [smem:[#allocation2 + $0x1]]  ;;  %s357_s12 = sld [smem:[#allocation2]]  ;;  %vm1062_vm3 = vcmask 64512  }
  0x48   :  { %1414 = vmatpush3.bf16.msra.mxu1 %v1413_v4  ;;  %v87_v12 = vld [vmem:[%s2012_s1] sm:$0xff]  ;;  %v265_v17 = vld [vmem:[%s2017_s6 + $0x18] sm:$0xff]  ;;  %v1182_v19 = vld [vmem:[#allocation6] ss:$0 sm:$0xff]  ;;  %s1189_s14 = sld [smem:[#allocation2 + $0x2]]  ;;  %s1192_s15 = sld [smem:[#allocation2 + $0x3]] }
  0x49   :  { %1411 = vmatpush3.bf16.msra.mxu0 %v1410_v7  ;;  %1415 = vmatprep.subr.bf16.mxu1 %v1671_v3  ;;  %v262_v13 = vld [vmem:[%s2017_s6] sm:$0xff]  ;;  %v1422_v18 = vpack.c.bf16 %v265_v17, %v264_v15  ;;  %s1674_s6 = smov 96   ;;  %v352_v32 = vld [vmem:[#allocation7] sm:$0xff]  ;;  %v355_v38 = vld [vmem:[#allocation7 + $0x18] sm:$0xff]  ;;  %s1195_s24 = sld [smem:[#allocation2 + $0x4]] }
  0x4a   :  { %1418 = vmatprep.subr.bf16.mxu0 %v1671_v3  ;;  %v1419_v16 = vpack.c.bf16 %v263_v14, %v262_v13  ;;  %v353_v33 = vld [vmem:[#allocation7 + $0x8] sm:$0xff]  ;;  %v354_v37 = vld [vmem:[#allocation7 + $0x10] sm:$0xff]  ;;  %s1895_s17 = sld [smem:[#allocation2 + $0x5]]  ;;  %s1204_s1 = sld [smem:[#allocation2 + $0x7]] }
  0x4b   :  { %v1844_v34 = vpack.c.bf16 %v353_v33, %v352_v32  ;;  %v1850_v39 = vpack.c.bf16 %v355_v38, %v354_v37  ;;  %v931_v13 = vld [vmem:[%s2019_s8 + $0x8] sm:$0xff]  ;;  %s1676_s29 = smov [#allocation10]  }
  0x4c   :  { %1279 = vmatmul.mubr.msk.f32.vlgmr.msra.gmra.mrb[0].mxu0 %vm98_vm1, %v88_v11  ;;  %1417 = vmatpush3.bf16.msra.mxu1 %v1416_v10  ;;  %s1152_s5 = sshll.u32 %s1676_s29, 4  ;;  %s1153_s5 = int_to_ptr.vmem [resolvable:$true] %s1152_s5 }
  0x4d   :  { %1300 = vmatprep.mubr.msk.f32.mxu0 %vm1672_vm0, %v1673_v8  ;;  %1424 = vmatprep.subr.bf16.mxu1 %v1671_v3  ;;  %s358_s13 = ssub.f32 %s1187_s30, %s357_s12  ;;  %p1616_p0 = scmp.lt.s32.totalorder %s1153_s5, %s1153_s5 }
  0x4e   :  { %1420 = vmatpush3.bf16.msra.mxu0 %v1419_v16  ;;  %s439_s0 = ssub.f32 %s1189_s14, %s1187_s30 }
  0x4f   :  { %1290 = vmatmul.mubr.msk.f32.vlgmr.msra.gmra.mrb[0].mxu1 %vm176_vm2, %v87_v12  ;;  %1421 = vmatprep.subr.bf16.mxu0 %v1671_v3  ;;  %v433_v49 = vstv %s358_s13  ;;  %s520_s9 = ssub.f32 %s1192_s15, %s1189_s14 }
  0x50   :  { %1311 = vmatprep.mubr.msk.f32.mxu1 %vm1672_vm0, %v1673_v8  ;;  %1426 = vmatpush3.bf16.msra.mxu1 %v1844_v34  ;;  %v514_v55 = vstv %s439_s0  ;;  %s601_s16 = ssub.f32 %s1195_s24, %s1192_s15 }
  0x51   :  { %1427 = vmatprep.subr.bf16.mxu1 %v1671_v3  ;;  %v595_v61 = vstv %s520_s9  ;;  %s682_s19 = ssub.f32 %s1895_s17, %s1195_s24 }
  0x52   :  { %1423 = vmatpush3.bf16.msra.mxu0 %v1422_v18  ;;  %v676_v4 = vstv %s601_s16  ;;  %v932_v18 = vld [vmem:[%s2019_s8 + $0x10] sm:$0xff] }
  0x53   :  { %1430 = vmatprep.subr.bf16.mxu0 %v1671_v3  ;;  %v757_v11 = vstv %s682_s19 }
  0x54   :  { %1429 = vmatpush3.bf16.msra.mxu1 %v1850_v39 }
  0x55   :  { %1436 = vmatprep.subr.bf16.mxu1 %v1671_v3 }
 0x11f   :  { %v168_v20 = vpop.f32.mrb[0].mxu0 }
 0x120   :  { %v169_v21 = vadd.f32 %v1182_v19, %v168_v20  ;;  %v1280_v22 = vpop.f32.mrb[1].mxu0  ;;  %v933_v19 = vld [vmem:[%s2019_s8 + $0x18] sm:$0xff] }
 0x121   :  { %v1470_v20 = vpack.c.bf16 %v933_v19, %v932_v18 }
 0x122   :  { %v246_v23 = vpop.f32.mrb[0].mxu1 }
 0x123   :  { %v250_v24 = vadd.f32 %v246_v23, %v169_v21  ;;  %v1291_v25 = vpop.f32.mrb[1].mxu1 }
 0x125   :  { %v1185_v26 = vmul.f32 -1.442695, %v250_v24 }
 0x127   :  { %1489 = vpow2.f32 %v1185_v26 }
 0x131   :  { %v1490_v27 = vpop.eup %1489 }
 0x132   :  { %v254_v28 = vadd.f32 1.0, %v1490_v27  ;;  %v1929_v27 = vld [vmem:[#allocation9] ss:$0 sm:$0xff] }
 0x134   :  { %1491 = vrcp.f32 %v254_v28 }
 0x13e   :  { %v1492_v29 = vpop.eup %1491 }
 0x13f   :  { %258 = vrot.lane.b32.xlu0 %v1492_v29, %s1674_s6  ;;  %v344_v42 = vsub.f32 1.0, %v1492_v29  ;;  %v350_v45 = vmul.f32 %v1492_v29, %v87_v12  ;;  %s1611_s6 = scalar_lea.vmem %s1153_s5, 896 }
 0x140   :  { %p1612_p13 = scmp.ne.s32.totalorder %s1153_s5, %s1611_s6  ;;  %p1617_p1 = scmp.lt.s32.totalorder %s1611_s6, %s1611_s6 }
 0x142   :  { %p1618_p2 = por %p1617_p1, %p1616_p0 }
 0x144   :  { %p1619_p3 = pnand %p1618_p2, %p1612_p13 }
 0x1b1   :  { %v259_v30 = vpop.permute.xlu0 %258 }
 0x1b2   :  { %v261_v31 = vmul.f32 %v259_v30, %v87_v12  ;;  %v930_v12 = vld [vmem:[%s2019_s8] sm:$0xff]  ;;  %s1925_s8 = sld [smem:[#allocation2 + $0x6]] }
 0x1b3   :  { %v1467_v16 = vpack.c.bf16 %v931_v13, %v930_v12 }
 0x1b4   :  { %1301 = vmatmul.mubr.msk.f32.vlgmr.msra.gmra.mrb[2].mxu0 %vm176_vm2, %v261_v31 }
 0x1b5   :  { %1322 = vmatprep.mubr.msk.f32.mxu0 %vm1672_vm0, %v1673_v8  ;;  %1432 = vmatpush3.bf16.msra.mxu0 %v1844_v34 }
 0x1b6   :  { %1433 = vmatprep.subr.bf16.mxu0 %v1671_v3 }
 0x1b8   :  { %s763_s25 = ssub.f32 %s1925_s8, %s1895_s17 }
 0x1b9   :  { %1435 = vmatpush3.bf16.msra.mxu0 %v1850_v39  ;;  %s844_s26 = ssub.f32 %s1204_s1, %s1925_s8 }
 0x1ba   :  { %1442 = vmatprep.subr.bf16.mxu0 %v1671_v3  ;;  %v838_v29 = vstv %s763_s25 }
 0x287   :  { %v335_v35 = vpop.f32.mrb[2].mxu0 }
 0x288   :  { %340 = vrot.lane.b32.xlu0 %v335_v35, %s1675_s18  ;;  %v1302_v36 = vpop.f32.mrb[3].mxu0 }
 0x2fa   :  { %v341_v40 = vpop.permute.xlu0 %340 }
 0x2fb   :  { %v343_v41 = vadd.f32 %v341_v40, %v169_v21 }
 0x2fd   :  { %346 = vrot.lane.b32.xlu1 %v343_v41, %s1675_s18 }
 0x36f   :  { %v347_v43 = vpop.permute.xlu1 %346 }
 0x370   :  { %v349_v44 = vmul.f32 %v347_v43, %v344_v42 }
 0x372   :  { %v351_v46 = vadd.f32 %v350_v45, %v349_v44 }
 0x374   :  { %1312 = vmatmul.mubr.msk.f32.vlgmr.msra.gmra.mrb[2].mxu1 %vm176_vm2, %v351_v46 }
 0x375   :  { %1438 = vmatpush3.bf16.msra.mxu1 %v1844_v34  ;;  %1333 = vmatprep.mubr.msk.f32.mxu1 %vm1672_vm0, %v1673_v8 }
 0x376   :  { %1439 = vmatprep.subr.bf16.mxu1 %v1671_v3 }
 0x379   :  { %1441 = vmatpush3.bf16.msra.mxu1 %v1850_v39 }
 0x37a   :  { %1448 = vmatprep.subr.bf16.mxu1 %v1671_v3 }
 0x447   :  { %v428_v47 = vpop.f32.mrb[2].mxu1 }
 0x448   :  { %1493 = vtanh.f32 %v428_v47  ;;  %v1313_v48 = vpop.f32.mrb[3].mxu1 }
 0x452   :  { %v1494_v50 = vpop.eup %1493 }
 0x453   :  { %v434_v51 = vmul.f32 %v1494_v50, %v433_v49 }
 0x455   :  { %v435_v52 = vadd.f32 %v434_v51, %v351_v46 }
 0x457   :  { %436 = vst.msk [vmem:[#allocation10] sm:$0xff] %vm176_vm2, %v435_v52  ;;  %1323 = vmatmul.mubr.msk.f32.vlgmr.msra.gmra.mrb[4].mxu0 %vm176_vm2, %v435_v52 }
 0x458   :  { %1444 = vmatpush3.bf16.msra.mxu0 %v1844_v34  ;;  %1344 = vmatprep.mubr.msk.f32.mxu0 %vm1672_vm0, %v1673_v8 }
 0x459   :  { %1445 = vmatprep.subr.bf16.mxu0 %v1671_v3 }
 0x45c   :  { %1447 = vmatpush3.bf16.msra.mxu0 %v1850_v39 }
 0x45d   :  { %1454 = vmatprep.subr.bf16.mxu0 %v1671_v3 }
 0x45e   :  { %v923_v21 = vld [vmem:[#allocation10] sm:$0xff] }
 0x52a   :  { %v509_v53 = vpop.f32.mrb[4].mxu0 }
 0x52b   :  { %1495 = vtanh.f32 %v509_v53  ;;  %v1324_v54 = vpop.f32.mrb[5].mxu0 }
 0x535   :  { %v1496_v56 = vpop.eup %1495 }
 0x536   :  { %v515_v57 = vmul.f32 %v1496_v56, %v514_v55 }
 0x538   :  { %v516_v58 = vadd.f32 %v515_v57, %v435_v52 }
 0x53a   :  { %517 = vst.msk [vmem:[#allocation10 + $0x8] sm:$0xff] %vm176_vm2, %v516_v58  ;;  %1334 = vmatmul.mubr.msk.f32.vlgmr.msra.gmra.mrb[4].mxu1 %vm176_vm2, %v516_v58 }
 0x53b   :  { %1450 = vmatpush3.bf16.msra.mxu1 %v1844_v34  ;;  %1355 = vmatprep.mubr.msk.f32.mxu1 %vm1672_vm0, %v1673_v8 }
 0x53c   :  { %1451 = vmatprep.subr.bf16.mxu1 %v1671_v3 }
 0x53f   :  { %1453 = vmatpush3.bf16.msra.mxu1 %v1850_v39 }
 0x540   :  { %1460 = vmatprep.subr.bf16.mxu1 %v1671_v3 }
 0x541   :  { %v924_v22 = vld [vmem:[#allocation10 + $0x8] sm:$0xff] }
 0x60d   :  { %v590_v59 = vpop.f32.mrb[4].mxu1 }
 0x60e   :  { %1497 = vtanh.f32 %v590_v59  ;;  %v1335_v60 = vpop.f32.mrb[5].mxu1  ;;  %v919_v59 = vstv %s844_s26 }
 0x618   :  { %v1498_v62 = vpop.eup %1497 }
 0x619   :  { %v596_v63 = vmul.f32 %v1498_v62, %v595_v61 }
 0x61b   :  { %v597_v0 = vadd.f32 %v596_v63, %v516_v58 }
 0x61d   :  { %598 = vst.msk [vmem:[#allocation10 + $0x10] sm:$0xff] %vm176_vm2, %v597_v0  ;;  %1345 = vmatmul.mubr.msk.f32.vlgmr.msra.gmra.mrb[6].mxu0 %vm176_vm2, %v597_v0 }
 0x61e   :  { %1456 = vmatpush3.bf16.msra.mxu0 %v1844_v34  ;;  %1366 = vmatprep.mubr.msk.f32.mxu0 %vm1672_vm0, %v1673_v8 }
 0x61f   :  { %1457 = vmatprep.subr.bf16.mxu0 %v1671_v3 }
 0x622   :  { %1459 = vmatpush3.bf16.msra.mxu0 %v1850_v39 }
 0x623   :  { %1466 = vmatprep.subr.bf16.mxu0 %v1671_v3 }
 0x624   :  { %v925_v23 = vld [vmem:[#allocation10 + $0x10] sm:$0xff] }
 0x6f0   :  { %v671_v1 = vpop.f32.mrb[6].mxu0 }
 0x6f1   :  { %1499 = vtanh.f32 %v671_v1  ;;  %v1346_v2 = vpop.f32.mrb[7].mxu0 }
 0x6fb   :  { %v1500_v5 = vpop.eup %1499 }
 0x6fc   :  { %v677_v6 = vmul.f32 %v1500_v5, %v676_v4 }
 0x6fe   :  { %v678_v7 = vadd.f32 %v677_v6, %v597_v0 }
 0x700   :  { %679 = vst.msk [vmem:[#allocation10 + $0x18] sm:$0xff] %vm176_vm2, %v678_v7  ;;  %1356 = vmatmul.mubr.msk.f32.vlgmr.msra.gmra.mrb[6].mxu1 %vm176_vm2, %v678_v7 }
 0x701   :  { %1462 = vmatpush3.bf16.msra.mxu1 %v1844_v34  ;;  %1377 = vmatprep.mubr.msk.f32.mxu1 %vm1672_vm0, %v1673_v8 }
 0x702   :  { %1463 = vmatprep.subr.bf16.mxu1 %v1671_v3 }
 0x705   :  { %1465 = vmatpush3.bf16.msra.mxu1 %v1850_v39 }
 0x706   :  { %1472 = vmatprep.subr.bf16.mxu1 %v1671_v3 }
 0x707   :  { %v926_v24 = vld [vmem:[#allocation10 + $0x18] sm:$0xff] }
 0x7d3   :  { %v752_v9 = vpop.f32.mrb[6].mxu1 }
 0x7d4   :  { %1501 = vtanh.f32 %v752_v9  ;;  %v1357_v10 = vpop.f32.mrb[7].mxu1 }
 0x7de   :  { %v1502_v14 = vpop.eup %1501 }
 0x7df   :  { %v758_v15 = vmul.f32 %v1502_v14, %v757_v11 }
 0x7e1   :  { %v759_v17 = vadd.f32 %v758_v15, %v678_v7 }
 0x7e3   :  { %760 = vst.msk [vmem:[#allocation10 + $0x20] sm:$0xff] %vm176_vm2, %v759_v17  ;;  %1367 = vmatmul.mubr.msk.f32.vlgmr.msra.gmra.mrb[8].mxu0 %vm176_vm2, %v759_v17 }
 0x7e4   :  { %1468 = vmatpush3.bf16.msra.mxu0 %v1467_v16  ;;  %1388 = vmatprep.mubr.msk.f32.mxu0 %vm1672_vm0, %v1673_v8 }
 0x7e5   :  { %1469 = vmatprep.subr.bf16.mxu0 %v1671_v3 }
 0x7e8   :  { %1471 = vmatpush3.bf16.msra.mxu0 %v1470_v20 }
 0x7ea   :  { %v927_v48 = vld [vmem:[#allocation10 + $0x20] sm:$0xff] }
 0x7eb   :  { %1389 = vmatmul.mubr.msk.f32.vlgmr.msra.gmra.mrb[10].mxu0 %vm176_vm2, %v923_v21 }
 0x7ec   :  { %1391 = vmatprep.mubr.msk.f32.mxu0 %vm1672_vm0, %v1673_v8 }
 0x7ef   :  { %1392 = vmatmul.mubr.msk.f32.gmra.mrb[12].mxu0 %vm176_vm2, %v924_v22 }
 0x7f0   :  { %1394 = vmatprep.mubr.msk.f32.mxu0 %vm1672_vm0, %v1673_v8 }
 0x7f3   :  { %1395 = vmatmul.mubr.msk.f32.gmra.mrb[14].mxu0 %vm176_vm2, %v925_v23 }
 0x7f4   :  { %1397 = vmatprep.mubr.msk.f32.mxu0 %vm1672_vm0, %v1673_v8 }
 0x7f7   :  { %1398 = vmatmul.mubr.msk.f32.gmra.mrb[16].mxu0 %vm176_vm2, %v926_v24 }
 0x8b6   :  { %v833_v25 = vpop.f32.mrb[8].mxu0 }
 0x8b7   :  { %1503 = vtanh.f32 %v833_v25  ;;  %v1368_v26 = vpop.f32.mrb[9].mxu0 }
 0x8be   :  { %v1028_v28 = vpop.f32.mrb[10].mxu0 }
 0x8bf   :  { %v1029_v30 = vadd.f32 %v1929_v27, %v1028_v28  ;;  %v1390_v31 = vpop.f32.mrb[11].mxu0 }
 0x8c1   :  { %v1504_v32 = vpop.eup %1503  ;;  %v1063_v33 = vsel %vm1062_vm3, %v1029_v30, -inf }
 0x8c2   :  { %v839_v34 = vmul.f32 %v1504_v32, %v838_v29  ;;  %1064 = vmax.xlane.f32.xlu1 %v1063_v33  ;;  %v1033_v35 = vpop.f32.mrb[12].mxu0 }
 0x8c3   :  { %v1934_v36 = vadd.f32 %v1929_v27, %v1033_v35  ;;  %v1393_v37 = vpop.f32.mrb[13].mxu0 }
 0x8c4   :  { %v840_v38 = vadd.f32 %v839_v34, %v759_v17 }
 0x8c5   :  { %v1066_v39 = vsel %vm1062_vm3, %v1934_v36, -inf }
 0x8c6   :  { %1067 = vmax.xlane.f32.xlu0 %v1066_v39  ;;  %v1038_v40 = vpop.f32.mrb[14].mxu0  ;;  %841 = vst.msk [vmem:[#allocation10 + $0x28] sm:$0xff] %vm176_vm2, %v840_v38  ;;  %1378 = vmatmul.mubr.msk.f32.vlgmr.msra.gmra.mrb[8].mxu1 %vm176_vm2, %v840_v38 }
 0x8c7   :  { %v1039_v41 = vadd.f32 %v1929_v27, %v1038_v40  ;;  %1474 = vmatpush3.bf16.msra.mxu1 %v1467_v16  ;;  %v1396_v42 = vpop.f32.mrb[15].mxu0  ;;  %1400 = vmatprep.mubr.msk.f32.mxu1 %vm1672_vm0, %v1673_v8 }
 0x8c8   :  { %1473 = vmatprep.subr.bf16.mxu1 %v1671_v3 }
 0x8c9   :  { %v1069_v43 = vsel %vm1062_vm3, %v1039_v41, -inf }
 0x8ca   :  { %1070 = vmax.xlane.f32.xlu0 %v1069_v43  ;;  %v1043_v44 = vpop.f32.mrb[16].mxu0 }
 0x8cb   :  { %v1946_v45 = vadd.f32 %v1929_v27, %v1043_v44  ;;  %1475 = vmatpush3.bf16.msra.mxu1 %v1470_v20  ;;  %v1399_v46 = vpop.f32.mrb[17].mxu0 }
 0x8cd   :  { %v1072_v47 = vsel %vm1062_vm3, %v1946_v45, -inf  ;;  %v928_v3 = vld [vmem:[#allocation10 + $0x28] sm:$0xff] }
 0x8ce   :  { %1073 = vmax.xlane.f32.xlu1 %v1072_v47  ;;  %1401 = vmatmul.mubr.msk.f32.vlgmr.msra.gmra.mrb[10].mxu1 %vm176_vm2, %v927_v48 }
 0x8cf   :  { %1403 = vmatprep.mubr.msk.f32.mxu1 %vm1672_vm0, %v1673_v8 }
 0x8d2   :  { %1404 = vmatmul.mubr.msk.f32.gmra.mrb[12].mxu1 %vm176_vm2, %v928_v3 }
 0x8d3   :  { %1406 = vmatprep.mubr.msk.f32.mxu1 %vm1672_vm0, %v1673_v8 }
 0x94f   :  { %v1065_v50 = vpop.xlane.xlu1 %1064 }
 0x950   :  { %v1084_v51 = vsub.f32 %v1029_v30, %v1065_v50 }
 0x952   :  { %v1091_v55 = vmul.f32 1.442695, %v1084_v51 }
 0x953   :  { %v1068_v49 = vpop.xlane.xlu0 %1067 }
 0x954   :  { %v1085_v25 = vsub.f32 %v1934_v36, %v1068_v49 }
 0x956   :  { %v1093_v26 = vmul.f32 1.442695, %v1085_v25 }
 0x957   :  { %v1071_v52 = vpop.xlane.xlu0 %1070 }
 0x958   :  { %v1086_v56 = vsub.f32 %v1039_v41, %v1071_v52 }
 0x95a   :  { %v1095_v57 = vmul.f32 1.442695, %v1086_v56 }
 0x95b   :  { %v1074_v12 = vpop.xlane.xlu1 %1073 }
 0x95c   :  { %v1087_v28 = vsub.f32 %v1946_v45, %v1074_v12 }
 0x95e   :  { %v1097_v29 = vmul.f32 1.442695, %v1087_v28 }
 0x999   :  { %v914_v53 = vpop.f32.mrb[8].mxu1 }
 0x99a   :  { %1505 = vtanh.f32 %v914_v53  ;;  %v1379_v54 = vpop.f32.mrb[9].mxu1 }
 0x99b   :  { %1507 = vpow2.f32 %v1091_v55 }
 0x99c   :  { %1509 = vpow2.f32 %v1095_v57 }
 0x9a1   :  { %v1048_v58 = vpop.f32.mrb[10].mxu1 }
 0x9a2   :  { %v1049_v60 = vadd.f32 %v1929_v27, %v1048_v58  ;;  %v1402_v61 = vpop.f32.mrb[11].mxu1 }
 0x9a4   :  { %v1506_v8 = vpop.eup %1505  ;;  %v1075_v62 = vsel %vm1062_vm3, %v1049_v60, -inf }
 0x9a5   :  { %v920_v63 = vmul.f32 %v1506_v8, %v919_v59  ;;  %1076 = vmax.xlane.f32.xlu0 %v1075_v62  ;;  %v1053_v0 = vpop.f32.mrb[12].mxu1  ;;  %v1508_v6 = vpop.eup %1507 }
 0x9a6   :  { %v1054_v1 = vadd.f32 %v1929_v27, %v1053_v0  ;;  %v1405_v2 = vpop.f32.mrb[13].mxu1  ;;  %v1105_v7 = vsel %vm1062_vm3, %v1508_v6, 0.0  ;;  %v1510_v9 = vpop.eup %1509 }
 0x9a7   :  { %v921_v4 = vadd.f32 %v920_v63, %v840_v38  ;;  %v1111_v10 = vsel %vm1062_vm3, %v1510_v9, 0.0 }
 0x9a8   :  { %v1078_v5 = vsel %vm1062_vm3, %v1054_v1, -inf }
 0x9a9   :  { %922 = vst.msk [vmem:[#allocation10 + $0x30] sm:$0xff] %vm176_vm2, %v921_v4  ;;  %1079 = vmax.xlane.f32.xlu1 %v1078_v5 }
 0x9ad   :  { %1106 = vadd.xlane.f32.xlu1 %v1105_v7 }
 0x9b0   :  { %v929_v11 = vld [vmem:[#allocation10 + $0x30] sm:$0xff] }
 0x9b1   :  { %1112 = vadd.xlane.f32.xlu1 %v1111_v10  ;;  %1407 = vmatmul.mubr.msk.f32.gmra.mrb[14].mxu1 %vm176_vm2, %v929_v11 }
 0xa32   :  { %v1077_v13 = vpop.xlane.xlu0 %1076 }
 0xa33   :  { %v1088_v14 = vsub.f32 %v1049_v60, %v1077_v13 }
 0xa35   :  { %v1099_v15 = vmul.f32 1.442695, %v1088_v14 }
 0xa36   :  { %v1080_v16 = vpop.xlane.xlu1 %1079 }
 0xa37   :  { %1511 = vpow2.f32 %v1099_v15  ;;  %v1089_v30 = vsub.f32 %v1054_v1, %v1080_v16 }
 0xa39   :  { %v1101_v31 = vmul.f32 1.442695, %v1089_v30 }
 0xa3a   :  { %v1107_v17 = vpop.xlane.xlu1 %1106 }
 0xa3b   :  { %1513 = vrcp.f32 %v1107_v17 }
 0xa3e   :  { %v1113_v18 = vpop.xlane.xlu1 %1112 }
 0xa3f   :  { %1515 = vrcp.f32 %v1113_v18 }
 0xa40   :  { %1517 = vpow2.f32 %v1093_v26 }
 0xa41   :  { %v1512_v19 = vpop.eup %1511  ;;  %1519 = vpow2.f32 %v1097_v29 }
 0xa42   :  { %v1117_v20 = vsel %vm1062_vm3, %v1512_v19, 0.0  ;;  %1521 = vpow2.f32 %v1101_v31 }
 0xa43   :  { %1118 = vadd.xlane.f32.xlu1 %v1117_v20 }
 0xa45   :  { %v1514_v21 = vpop.eup %1513 }
 0xa46   :  { %v1133_v22 = vmul.f32 %v1514_v21, %v1508_v6 }
 0xa48   :  { %1140 = vst.msk [vmem:[#allocation11] sm:$0xff] %vm1062_vm3, %v1133_v22 }
 0xa49   :  { %v1516_v23 = vpop.eup %1515 }
 0xa4a   :  { %v1135_v24 = vmul.f32 %v1516_v23, %v1510_v9  ;;  %v1518_v37 = vpop.eup %1517 }
 0xa4b   :  { %v1108_v38 = vsel %vm1062_vm3, %v1518_v37, 0.0  ;;  %v1520_v36 = vpop.eup %1519 }
 0xa4c   :  { %1142 = vst.msk [vmem:[#allocation11 + $0x10] sm:$0xff] %vm1062_vm3, %v1135_v24  ;;  %v1114_v39 = vsel %vm1062_vm3, %v1520_v36, 0.0  ;;  %v1522_v40 = vpop.eup %1521 }
 0xa4d   :  { %v1120_v41 = vsel %vm1062_vm3, %v1522_v40, 0.0 }
 0xa84   :  { %v1058_v32 = vpop.f32.mrb[14].mxu1 }
 0xa85   :  { %v1059_v33 = vadd.f32 %v1929_v27, %v1058_v32  ;;  %v1408_v34 = vpop.f32.mrb[15].mxu1 }
 0xa87   :  { %v1081_v35 = vsel %vm1062_vm3, %v1059_v33, -inf }
 0xa88   :  { %1082 = vmax.xlane.f32.xlu0 %v1081_v35 }
 0xa8c   :  { %1109 = vadd.xlane.f32.xlu0 %v1108_v38 }
 0xa90   :  { %1115 = vadd.xlane.f32.xlu0 %v1114_v39 }
 0xa94   :  { %1121 = vadd.xlane.f32.xlu0 %v1120_v41 }
 0xad0   :  { %v1119_v42 = vpop.xlane.xlu1 %1118 }
 0xad1   :  { %1523 = vrcp.f32 %v1119_v42 }
 0xadb   :  { %v1524_v27 = vpop.eup %1523 }
 0xadc   :  { %v1137_v43 = vmul.f32 %v1524_v27, %v1512_v19 }
 0xade   :  { %1144 = vst.msk [vmem:[#allocation11 + $0x20] sm:$0xff] %vm1062_vm3, %v1137_v43 }
 0xb15   :  { %v1083_v44 = vpop.xlane.xlu0 %1082 }
 0xb16   :  { %v1090_v45 = vsub.f32 %v1059_v33, %v1083_v44 }
 0xb18   :  { %v1103_v46 = vmul.f32 1.442695, %v1090_v45 }
 0xb19   :  { %v1110_v47 = vpop.xlane.xlu0 %1109 }
 0xb1a   :  { %1525 = vpow2.f32 %v1103_v46 }
 0xb1b   :  { %1527 = vrcp.f32 %v1110_v47 }
 0xb1d   :  { %v1116_v48 = vpop.xlane.xlu0 %1115 }
 0xb1e   :  { %1529 = vrcp.f32 %v1116_v48 }
 0xb21   :  { %v1122_v3 = vpop.xlane.xlu0 %1121 }
 0xb22   :  { %1531 = vrcp.f32 %v1122_v3 }
 0xb24   :  { %v1526_v49 = vpop.eup %1525 }
 0xb25   :  { %v1528_v50 = vpop.eup %1527  ;;  %v1123_v51 = vsel %vm1062_vm3, %v1526_v49, 0.0 }
 0xb26   :  { %v1134_v52 = vmul.f32 %v1528_v50, %v1518_v37  ;;  %1124 = vadd.xlane.f32.xlu1 %v1123_v51 }
 0xb28   :  { %v1530_v53 = vpop.eup %1529  ;;  %1141 = vst.msk [vmem:[#allocation11 + $0x8] sm:$0xff] %vm1062_vm3, %v1134_v52 }
 0xb29   :  { %v1136_v54 = vmul.f32 %v1530_v53, %v1520_v36 }
 0xb2b   :  { %1143 = vst.msk [vmem:[#allocation11 + $0x18] sm:$0xff] %vm1062_vm3, %v1136_v54 }
 0xb2c   :  { %v1532_v55 = vpop.eup %1531 }
 0xb2d   :  { %v1138_v56 = vmul.f32 %v1532_v55, %v1522_v40 }
 0xb2f   :  { %1145 = vst.msk [vmem:[#allocation11 + $0x28] sm:$0xff] %vm1062_vm3, %v1138_v56 }
 0xb30   :  { %1622 = shalt.err (!%p1619_p3)
}
 0xb31   :  { %s1623_s12 = scalar_lea.hbm %s2021_s10, 896 }
 0xb32   :  { %p1624_p4 = scmp.ne.s32.totalorder %s2021_s10, %s1623_s12  ;;  %p1627_p5 = scmp.lt.u32.totalorder %s1623_s12, %s2021_s10 }
 0xb34   :  { %p1629_p6 = pnand %p1627_p5, %p1624_p4 }
 0xb36   :  { %1632 = shalt.err (!%p1629_p6)
}
 0xb37   :  { %1158 = dma.vmem_to_hbm [thread:$0]  %s1153_s5, 896, %s2021_s10, [#allocation4], %s1666_s27, %s1666_s27, %s1667_s28  }
 0xb38   :  { %s1677_s16 = smov [#allocation11]  }
 0xb39   :  { %s1164_s17 = sshll.u32 %s1677_s16, 4  ;;  %s1165_s17 = int_to_ptr.vmem [resolvable:$true] %s1164_s17 }
 0xb3a   :  { %s1633_s19 = scalar_lea.vmem %s1165_s17, 896  ;;  %p1638_p8 = scmp.lt.s32.totalorder %s1165_s17, %s1165_s17 }
 0xb3b   :  { %p1634_p7 = scmp.ne.s32.totalorder %s1165_s17, %s1633_s19  ;;  %p1639_p9 = scmp.lt.s32.totalorder %s1633_s19, %s1633_s19 }
 0xb3d   :  { %p1640_p10 = por %p1639_p9, %p1638_p8 }
 0xb3f   :  { %p1641_p11 = pnand %p1640_p10, %p1634_p7 }
 0xbb3   :  { %v1125_v57 = vpop.xlane.xlu1 %1124 }
 0xbb4   :  { %1533 = vrcp.f32 %v1125_v57 }
 0xbbe   :  { %v1534_v58 = vpop.eup %1533 }
 0xbbf   :  { %v1139_v59 = vmul.f32 %v1534_v58, %v1526_v49 }
 0xbc1   :  { %1146 = vst.msk [vmem:[#allocation11 + $0x30] sm:$0xff] %vm1062_vm3, %v1139_v59 }
 0xbc2   :  { %1644 = shalt.err (!%p1641_p11)
}
 0xbc3   :  { %s1645_s10 = scalar_lea.hbm %s2022_s11, 896 }
 0xbc4   :  { %p1646_p12 = scmp.ne.s32.totalorder %s2022_s11, %s1645_s10  ;;  %p1649_p13 = scmp.lt.u32.totalorder %s1645_s10, %s2022_s11 }
 0xbc6   :  { %p1651_p0 = pnand %p1649_p13, %p1646_p12 }
 0xbc8   :  { %1654 = shalt.err (!%p1651_p0)
}
 0xbc9   :  { %1170 = dma.vmem_to_hbm [thread:$0]  %s1165_s17, 896, %s2022_s11, [#allocation12], %s1666_s27, %s1666_s27, %s1667_s28  }
 0xbca   :  { %1661 = dma.done.wait [#allocation4], 896  }
 0xbcb   :  { %1662 = vsyncadd [#allocation4], 4294966400 }
 0xbcc   :  { %1663 = dma.done.wait [#allocation12], 896  }
 0xbcd   :  { %1664 = vsyncadd [#allocation12], 4294966400 }
 0xbce   :  { %1177 = vsyncpa [#allocation3], 1 }
 0xbcf   :  { %1178 = vsyncpa [#allocation8], 1 }
 0xbd0   :  { %1179 = vsyncpa [#allocation4], 1 }
 0xbd1   :  { %1180 = vsyncpa [#allocation12], 1 }
 0xbd2   :  { %1181 = vsyncpa [#allocation5], 1 }

</bundles_post_ra>
